<compile_context>
chip_gen: v5e
topology: v5e:2x2
jax: 0.10.0
libtpu: 0.0.40
codegen_flags: <defaults>
</compile_context>

<pallas_src>
import functools
import math

import jax
import jax.numpy as jnp
from jax.experimental import pallas as pl
from jax.experimental.pallas import tpu as pltpu


# --------------------------------------------------------------------------
# small helpers
# --------------------------------------------------------------------------
def _round_up(x, m):
    return (x + m - 1) // m * m


def _pad2(x, r, c):
    return jnp.pad(x, ((0, r - x.shape[0]), (0, c - x.shape[1])))


def _nbytes(shape, dtype):
    return math.prod(shape) * jnp.dtype(dtype).itemsize


_VMEM_CAP = [None]


def _vmem_cap_bytes():
    if _VMEM_CAP[0] is None:
        cap = 0
        try:
            info = pltpu.get_tpu_info()
            cap = int(getattr(info, "vmem_capacity_bytes", 0) or 0)
        except Exception:
            cap = 0
        if cap <= 0:
            kind = jax.devices()[0].device_kind.lower()
            if "v7" in kind or "7x" in kind:
                cap = 64 << 20
            elif "v2" in kind or "v3" in kind:
                cap = 16 << 20
            else:
                cap = 128 << 20          # v4 / v5e / v6e
        _VMEM_CAP[0] = cap
    return _VMEM_CAP[0]


def _mosaic_params(dims, *block_bytes):
    cap = _vmem_cap_bytes()
    budget = int(cap * 0.75)             # leave headroom below physical VMEM
    est = 2 * sum(block_bytes) + (4 << 20)
    return pltpu.CompilerParams(
        dimension_semantics=dims,
        vmem_limit_bytes=int(min(max(est, 16 << 20), budget)))


def _dot_nt(a, b):
    # a:[m,k] x b:[n,k] -> [m,n] = a @ b.T with f32 accumulation on the MXU.
    return jax.lax.dot_general(a, b, (((1,), (1,)), ((), ())),
                               preferred_element_type=jnp.float32)


# --------------------------------------------------------------------------
# kernel 1: tiled matmul (bf16 inputs, f32 accumulator)
# --------------------------------------------------------------------------
def matmul_kernel(a_ref, b_ref, o_ref, acc_ref):
    @pl.when(pl.program_id(2) == 0)
    def _():
        acc_ref[...] = jnp.zeros_like(acc_ref)

    acc_ref[...] += jnp.dot(a_ref[...], b_ref[...],
                            preferred_element_type=jnp.float32)

    @pl.when(pl.program_id(2) == pl.num_programs(2) - 1)
    def _():
        o_ref[...] = acc_ref[...].astype(o_ref.dtype)


def matmul_bf16(a, b, *, out_dtype=jnp.bfloat16, tm=None, tn=None, tk=None):
    m, k = a.shape
    k2, n = b.shape
    assert k == k2
    big = _vmem_cap_bytes() > (64 << 20)          # v5e / v6e: bigger tiles
    tm = tm or (512 if big else 256)
    tn = tn or (512 if big else 256)
    tk = tk or 512
    tm = min(tm, _round_up(m, 8))
    tn = min(tn, _round_up(n, 128))
    tk = min(tk, _round_up(k, 128))
    mp, kp, np_ = _round_up(m, tm), _round_up(k, tk), _round_up(n, tn)
    a_p = _pad2(a.astype(jnp.bfloat16), mp, kp)
    b_p = _pad2(b.astype(jnp.bfloat16), kp, np_)
    blocks = [_nbytes((tm, tk), jnp.bfloat16), _nbytes((tk, tn), jnp.bfloat16),
              _nbytes((tm, tn), out_dtype), _nbytes((tm, tn), jnp.float32)]
    out = pl.pallas_call(
        matmul_kernel,
        out_shape=jax.ShapeDtypeStruct((mp, np_), out_dtype),
        grid=(mp // tm, np_ // tn, kp // tk),
        in_specs=[pl.BlockSpec((tm, tk), lambda i, j, kk: (i, kk)),
                  pl.BlockSpec((tk, tn), lambda i, j, kk: (kk, j))],
        out_specs=pl.BlockSpec((tm, tn), lambda i, j, kk: (i, j)),
        scratch_shapes=[pltpu.VMEM((tm, tn), jnp.float32)],
        compiler_params=_mosaic_params(("parallel", "parallel", "arbitrary"),
                                       *blocks),
    )(a_p, b_p)
    if mp != m or np_ != n:
        out = out[:m, :n]
    return out


# --------------------------------------------------------------------------
# kernel 2: fused GAT attention, all heads packed in one 128-lane block,
#           key-tiled online softmax -> aggregate -> +bias -> ELU
#           grid = (target-row tiles, source/key tiles)
# --------------------------------------------------------------------------
def gat_head_kernel(xw_rows_ref, xw_keys_ref, asrc_ref, adst_ref, mask_ref,
                    bias_ref, o_ref, m_sc, l_sc, acc_sc, *, num_heads, head_dim):
    kk = pl.program_id(1)

    @pl.when(kk == 0)
    def _():
        m_sc[...] = jnp.full(m_sc.shape, -1e30, m_sc.dtype)
        l_sc[...] = jnp.zeros_like(l_sc)
        acc_sc[...] = jnp.zeros_like(acc_sc)

    xw_rows = xw_rows_ref[...]                      # [tm, 128] bf16, resident across kk
    xw_keys = xw_keys_ref[...]                      # [tk, 128] bf16 (current key tile)
    valid = mask_ref[...] > 0                       # [tm, tk]  int8 adjacency (+self-loops)

    # all-head attention-logit pieces (one small MXU call each)
    a_src = _dot_nt(asrc_ref[...], xw_keys)         # [8, tk]  f32
    a_dst = _dot_nt(xw_rows, adst_ref[...])         # [tm, 8]  f32

    for h in range(num_heads):                      # unrolled, heads share mask / key tile
        raw = a_dst[:, h:h + 1] + a_src[h:h + 1, :]             # [tm, tk]
        e = jnp.maximum(raw, 0.2 * raw)                          # leaky_relu, slope 0.2
        e = jnp.where(valid, e, -1e30)
        m_prev = m_sc[h]                                         # [tm, 1]
        m_new = jnp.maximum(m_prev, jnp.max(e, axis=-1, keepdims=True))
        corr = jnp.exp(m_prev - m_new)
        p = jnp.exp(e - m_new)                                   # masked entries underflow to 0
        l_sc[h] = corr * l_sc[h] + jnp.sum(p, axis=-1, keepdims=True)
        acc_sc[h] = corr * acc_sc[h] + jnp.dot(p.astype(jnp.bfloat16), xw_keys,
                                               preferred_element_type=jnp.float32)
        m_sc[h] = m_new

    @pl.when(kk == pl.num_programs(1) - 1)
    def _():
        cols = jax.lax.broadcasted_iota(jnp.int32, o_ref.shape, 1)
        out = jnp.zeros(o_ref.shape, jnp.float32)
        for h in range(num_heads):
            # every real row has a self-loop -> l > 0; clamp only guards padding rows
            inv_l = pl.reciprocal(jnp.maximum(l_sc[h], 1e-20), approx=True)
            colmask = (cols >= h * head_dim) & (cols < (h + 1) * head_dim)
            out = jnp.where(colmask, acc_sc[h] * inv_l, out)
        out = out + bias_ref[...]
        out = jnp.where(out > 0, out, jnp.exp(out) - 1.0)        # ELU (alpha=1)
        o_ref[...] = out.astype(o_ref.dtype)


def gat_attention(xw, att_src_mat, att_dst_mat, mask, bias, *,
                  num_heads, head_dim, tm, tk):
    n_pad, hc_pad = xw.shape
    h_pad = att_src_mat.shape[0]
    grid = (n_pad // tm, n_pad // tk)
    kernel = functools.partial(gat_head_kernel, num_heads=num_heads,
                               head_dim=head_dim)
    blocks = [_nbytes((tm, hc_pad), jnp.bfloat16),         # xw row tile
              _nbytes((tk, hc_pad), jnp.bfloat16),         # xw key tile
              2 * _nbytes((h_pad, hc_pad), jnp.bfloat16),  # att matrices
              _nbytes((tm, tk), jnp.int8),                 # mask tile
              _nbytes((1, hc_pad), jnp.float32),           # bias
              _nbytes((tm, hc_pad), jnp.bfloat16),         # output tile
              num_heads * _nbytes((tm, hc_pad), jnp.float32),  # acc scratch
              4 * _nbytes((tm, tk), jnp.float32)]          # live softmax temporaries
    return pl.pallas_call(
        kernel,
        out_shape=jax.ShapeDtypeStruct((n_pad, hc_pad), jnp.bfloat16),
        grid=grid,
        in_specs=[
            pl.BlockSpec((tm, hc_pad), lambda i, kk: (i, 0)),      # XW target rows (resident)
            pl.BlockSpec((tk, hc_pad), lambda i, kk: (kk, 0)),     # XW key tile (streamed)
            pl.BlockSpec((h_pad, hc_pad), lambda i, kk: (0, 0)),   # att_src (packed per head)
            pl.BlockSpec((h_pad, hc_pad), lambda i, kk: (0, 0)),   # att_dst (packed per head)
            pl.BlockSpec((tm, tk), lambda i, kk: (i, kk)),         # adjacency mask tile (int8)
            pl.BlockSpec((1, hc_pad), lambda i, kk: (0, 0)),       # bias
        ],
        out_specs=pl.BlockSpec((tm, hc_pad), lambda i, kk: (i, 0)),
        scratch_shapes=[pltpu.VMEM((num_heads, tm, 1), jnp.float32),
                        pltpu.VMEM((num_heads, tm, 1), jnp.float32),
                        pltpu.VMEM((num_heads, tm, hc_pad), jnp.float32)],
        compiler_params=_mosaic_params(("parallel", "arbitrary"), *blocks),
    )(xw, xw, att_src_mat, att_dst_mat, mask, bias)


# --------------------------------------------------------------------------
# kernel 3: global_mean_pool (pooling matrix, node-tiled) -> Linear -> log_softmax
# --------------------------------------------------------------------------
def pool_lin_kernel(p_ref, h_ref, w_ref, b_ref, o_ref, acc_ref, *, num_classes):
    kk = pl.program_id(0)

    @pl.when(kk == 0)
    def _():
        acc_ref[...] = jnp.zeros_like(acc_ref)

    acc_ref[...] += jnp.dot(p_ref[...], h_ref[...],
                            preferred_element_type=jnp.float32)

    @pl.when(kk == pl.num_programs(0) - 1)
    def _():
        logits = jnp.dot(acc_ref[...].astype(jnp.bfloat16), w_ref[...],
                         preferred_element_type=jnp.float32) + b_ref[...]
        # TODO(synk): torch.isnan(x).any() -> raise has no in-kernel equivalent; checked host-side.
        cols = jax.lax.broadcasted_iota(jnp.int32, logits.shape, 1)
        logits = jnp.where(cols < num_classes, logits, -1e30)
        m = jnp.max(logits, axis=-1, keepdims=True)
        ex = jnp.exp(logits - m)                    # masked cols underflow to 0
        lse = m + jnp.log(jnp.sum(ex, axis=-1, keepdims=True))
        o_ref[...] = logits - lse


def pool_linear_logsoftmax(pool, h, w, b, *, num_classes):
    g_pad, n_pad = pool.shape
    f_pad = h.shape[1]
    c_pad = w.shape[1]
    tkn = min(512, n_pad)
    assert n_pad % tkn == 0
    kernel = functools.partial(pool_lin_kernel, num_classes=num_classes)
    blocks = [_nbytes((g_pad, tkn), jnp.bfloat16), _nbytes((tkn, f_pad), jnp.bfloat16),
              _nbytes((f_pad, c_pad), jnp.bfloat16), _nbytes((1, c_pad), jnp.float32),
              2 * _nbytes((g_pad, c_pad), jnp.float32), _nbytes((g_pad, f_pad), jnp.float32)]
    return pl.pallas_call(
        kernel,
        out_shape=jax.ShapeDtypeStruct((g_pad, c_pad), jnp.float32),
        grid=(n_pad // tkn,),
        in_specs=[pl.BlockSpec((g_pad, tkn), lambda kk: (0, kk)),
                  pl.BlockSpec((tkn, f_pad), lambda kk: (kk, 0)),
                  pl.BlockSpec((f_pad, c_pad), lambda kk: (0, 0)),
                  pl.BlockSpec((1, c_pad), lambda kk: (0, 0))],
        out_specs=pl.BlockSpec((g_pad, c_pad), lambda kk: (0, 0)),
        scratch_shapes=[pltpu.VMEM((g_pad, f_pad), jnp.float32)],
        compiler_params=_mosaic_params(("arbitrary",), *blocks),
    )(pool, h, w, b)


# --------------------------------------------------------------------------
# Parameter init (matches module __init__ shapes; exact init scheme not load-bearing)
# --------------------------------------------------------------------------
def init_params(key, input_feature, hidden_channels, num_head, num_classes):
    H, C = num_head, hidden_channels
    gat_params = []
    for f_in in [input_feature] + [H * C] * 3:            # 4 GATConv layers
        key, kw, ks, kd = jax.random.split(key, 4)
        lim_w = math.sqrt(6.0 / (f_in + H * C))            # glorot
        w = jax.random.uniform(kw, (f_in, H * C), jnp.float32, -lim_w, lim_w)
        lim_a = math.sqrt(6.0 / (C + 1))
        att_src = jax.random.uniform(ks, (H, C), jnp.float32, -lim_a, lim_a)
        att_dst = jax.random.uniform(kd, (H, C), jnp.float32, -lim_a, lim_a)
        bias = jnp.zeros((H * C,), jnp.float32)
        gat_params.append((w, att_src, att_dst, bias))
    key, kl, kb = jax.random.split(key, 3)
    lim = 1.0 / math.sqrt(H * C)
    lin_w = jax.random.uniform(kl, (H * C, num_classes), jnp.float32, -lim, lim)
    lin_b = jax.random.uniform(kb, (num_classes,), jnp.float32, -lim, lim)
    return gat_params, (lin_w, lin_b)


def _pack_att(att, num_heads, head_dim, h_pad, hc_pad):
    # att[h, c] -> row h, column h*C + c of an [h_pad, hc_pad] matrix (zeros elsewhere),
    # so one [8,128] x [128,*] MXU call produces every head's logit component at once.
    m = jnp.zeros((h_pad, hc_pad), jnp.float32)
    rows = jnp.repeat(jnp.arange(num_heads), head_dim)
    cols = jnp.arange(num_heads * head_dim)
    m = m.at[rows, cols].set(att.reshape(-1))
    return m.astype(jnp.bfloat16)


# --------------------------------------------------------------------------
# Forward (glue / layout plumbing in plain JAX, hot path in Pallas)
# --------------------------------------------------------------------------
def complex_gat_forward(x, edge_index, edge_attr, batch, gat_params, lin_params,
                        num_graphs, num_classes, num_head, hidden_channels):
    del edge_attr                      # GATConv is called with (x, edge_index) only
    H, C = num_head, hidden_channels
    HC = H * C
    # all heads packed into one 128-lane block
    # TODO(synk): generalize to H*C > 128 / H > 8 by using multiple lane blocks per head group.
    assert HC <= 128 and H <= 8
    HC_pad = _round_up(HC, 128)
    H_pad = 8
    n = x.shape[0]

    # attention tiles (row tile >= 32 for the int8 mask; key tile a multiple of 128)
    tm_att = min(256, pl.next_power_of_2(max(n, 32)))
    tk_att = min(512, pl.next_power_of_2(max(n, 128)))
    n_pad = _round_up(n, max(tm_att, tk_att))

    # Dense adjacency mask (row = target, col = source) with self-loops, stored as int8.
    # TODO(synk): for large static graphs this O(N^2) densification should be cached / replaced
    # by a sparse scalar-prefetch SpMM; kept inline here for self-containment.
    adj = jnp.zeros((n_pad, n_pad), jnp.float32)
    adj = adj.at[edge_index[1], edge_index[0]].set(1.0)
    adj = adj.at[jnp.arange(n), jnp.arange(n)].set(1.0)
    mask = adj.astype(jnp.int8)

    # TODO(synk): F.dropout(p) on x and GATConv's attention dropout are identity in eval
    # mode (training=False); not implemented.

    h = jnp.pad(x.astype(jnp.bfloat16), ((0, n_pad - n), (0, 0)))
    for (w, att_src, att_dst, bias) in gat_params:
        # weight rows padded to match h's (zero-padded) feature columns; cols to the packed
        # 128-lane head block -> XW is [n_pad, 128] with only H*C real columns computed once.
        w_p = _pad2(w, h.shape[1], HC_pad)
        xw = matmul_bf16(h, w_p, out_dtype=jnp.bfloat16)          # [n_pad, HC_pad]
        asrc_m = _pack_att(att_src, H, C, H_pad, HC_pad)
        adst_m = _pack_att(att_dst, H, C, H_pad, HC_pad)
        bias_p = _pad2(bias[None, :], 1, HC_pad)
        h = gat_attention(xw, asrc_m, adst_m, mask, bias_p,
                          num_heads=H, head_dim=C, tm=tm_att, tk=tk_att)

    # global_mean_pool as pooling matrix  P[g, node] = 1/|graph g|  (0 for padding).
    g_pad = _round_up(num_graphs, 8)
    batch_pad = jnp.pad(batch, (0, n_pad - n), constant_values=-1)
    onehot = (jnp.arange(g_pad)[:, None] == batch_pad[None, :]).astype(jnp.float32)
    counts = onehot.sum(axis=1, keepdims=True)
    pool = (onehot / jnp.maximum(counts, 1.0)).astype(jnp.bfloat16)

    lin_w, lin_b = lin_params
    c_pad = _round_up(num_classes, 128)
    lw_p = _pad2(lin_w, HC_pad, c_pad).astype(jnp.bfloat16)       # zero rows meet zero h cols
    lb_p = _pad2(lin_b[None, :], 1, c_pad)

    out = pool_linear_logsoftmax(pool, h, lw_p, lb_p, num_classes=num_classes)
    return out[:num_graphs, :num_classes]


if __name__ == "__main__":
    key = jax.random.PRNGKey(0)
    input_feature, hidden_channels, num_head, num_classes = 32, 8, 4, 4
    drop_out_prob = 0.5                                    # identity in eval mode
    num_nodes, num_graphs = 12, 2

    k_x, k_w = jax.random.split(key)
    x = jax.random.normal(k_x, (num_nodes, input_feature), jnp.float32)

    # Two graphs of 6 nodes each, directed ring edges within each graph.
    src = jnp.arange(num_nodes)
    dst = (src + 1) % 6 + (src // 6) * 6
    edge_index = jnp.stack([src, dst]).astype(jnp.int32)    # [2, E], src -> dst
    edge_attr = jnp.ones((num_nodes, 1), jnp.float32)       # unused by forward
    batch = jnp.array([0] * 6 + [1] * 6, jnp.int32)

    gat_params, lin_params = init_params(k_w, input_feature, hidden_channels,
                                         num_head, num_classes)

    out = complex_gat_forward(x, edge_index, edge_attr, batch, gat_params, lin_params,
                              num_graphs, num_classes, num_head, hidden_channels)
    jax.block_until_ready(out)
    assert out.shape == (num_graphs, num_classes)
    assert bool(jnp.all(jnp.isfinite(out)))                 # host-side NaN guard
    print("KERNEL_OK")
</pallas_src>

<mosaic_0001>
module attributes {stable_mosaic.version = 11 : i64} {
  func.func @matmul_kernel(%arg0: i32, %arg1: i32, %arg2: i32, %arg3: memref<128x128xbf16, #tpu.memory_space<vmem>>, %arg4: memref<128x128xbf16, #tpu.memory_space<vmem>>, %arg5: memref<128x128xbf16, #tpu.memory_space<vmem>>, %arg6: memref<128x128xf32, #tpu.memory_space<vmem>>) attributes {dimension_semantics = [#tpu.dimension_semantics<parallel>, #tpu.dimension_semantics<parallel>, #tpu.dimension_semantics<arbitrary>], iteration_bounds = array<i64: 1, 1, 1>, scalar_prefetch = 0 : i64, scratch_operands = 1 : i64, tpu.core_type = #tpu.core_type<tc>, window_params = [{transform_indices = @transform_0, window_bounds = array<i64: 128, 128>}, {transform_indices = @transform_1, window_bounds = array<i64: 128, 128>}, {transform_indices = @transform_2, window_bounds = array<i64: 128, 128>}]} {
    %c0_i32 = arith.constant 0 : i32
    %0 = arith.cmpi eq, %arg2, %c0_i32 : i32
    %1 = arith.extui %0 : i1 to i32
    %c0_i32_0 = arith.constant 0 : i32
    %2 = arith.cmpi ne, %1, %c0_i32_0 : i32
    scf.if %2 {
      %cst_10 = arith.constant 0.000000e+00 : f32
      %12 = vector.broadcast %cst_10 : f32 to vector<128x128xf32>
      %c0_11 = arith.constant 0 : index
      %c0_12 = arith.constant 0 : index
      %13 = vector.load %arg6[%c0_11, %c0_12] : memref<128x128xf32, #tpu.memory_space<vmem>>, vector<128x128xf32>
      tpu.vector_store %arg6[%c0_11, %c0_12], %12 {strides = array<i32>} : memref<128x128xf32, #tpu.memory_space<vmem>>, vector<128x128xf32>,
    } else {
    }
    %c0 = arith.constant 0 : index
    %c0_1 = arith.constant 0 : index
    %3 = vector.load %arg6[%c0, %c0_1] : memref<128x128xf32, #tpu.memory_space<vmem>>, vector<128x128xf32>
    %c0_2 = arith.constant 0 : index
    %c0_3 = arith.constant 0 : index
    %4 = vector.load %arg3[%c0_2, %c0_3] : memref<128x128xbf16, #tpu.memory_space<vmem>>, vector<128x128xbf16>
    %c0_4 = arith.constant 0 : index
    %c0_5 = arith.constant 0 : index
    %5 = vector.load %arg4[%c0_4, %c0_5] : memref<128x128xbf16, #tpu.memory_space<vmem>>, vector<128x128xbf16>
    %cst = arith.constant dense<0.000000e+00> : vector<128x128xf32>
    %6 = tpu.matmul %4, %5, %cst {dimension_numbers = #tpu.dot_dimension_numbers<[1], [0], [0], [1], [0, 0, 1, 1], [], []>} : vector<128x128xbf16>, vector<128x128xbf16>, vector<128x128xf32> -> vector<128x128xf32>
    %7 = arith.addf %3, %6 : vector<128x128xf32>
    %c0_6 = arith.constant 0 : index
    %c0_7 = arith.constant 0 : index
    %8 = vector.load %arg6[%c0_6, %c0_7] : memref<128x128xf32, #tpu.memory_space<vmem>>, vector<128x128xf32>
    tpu.vector_store %arg6[%c0_6, %c0_7], %7 {strides = array<i32>} : memref<128x128xf32, #tpu.memory_space<vmem>>, vector<128x128xf32>,
    %c0_i32_8 = arith.constant 0 : i32
    %9 = arith.cmpi eq, %arg2, %c0_i32_8 : i32
    %10 = arith.extui %9 : i1 to i32
    %c0_i32_9 = arith.constant 0 : i32
    %11 = arith.cmpi ne, %10, %c0_i32_9 : i32
    scf.if %11 {
      %c0_10 = arith.constant 0 : index
      %c0_11 = arith.constant 0 : index
      %12 = vector.load %arg6[%c0_10, %c0_11] : memref<128x128xf32, #tpu.memory_space<vmem>>, vector<128x128xf32>
      %13 = arith.truncf %12 : vector<128x128xf32> to vector<128x128xbf16>
      %c0_12 = arith.constant 0 : index
      %c0_13 = arith.constant 0 : index
      %14 = vector.load %arg5[%c0_12, %c0_13] : memref<128x128xbf16, #tpu.memory_space<vmem>>, vector<128x128xbf16>
      tpu.vector_store %arg5[%c0_12, %c0_13], %13 {strides = array<i32>} : memref<128x128xbf16, #tpu.memory_space<vmem>>, vector<128x128xbf16>,
    } else {
    }
    return
  }
  func.func @transform_0(%arg0: i32, %arg1: i32, %arg2: i32) -> (i32, i32) {
    %c0_i32 = arith.constant 0 : i32
    return %arg0, %arg2 : i32, i32
  }
  func.func @transform_1(%arg0: i32, %arg1: i32, %arg2: i32) -> (i32, i32) {
    %c0_i32 = arith.constant 0 : i32
    return %arg2, %arg1 : i32, i32
  }
  func.func @transform_2(%arg0: i32, %arg1: i32, %arg2: i32) -> (i32, i32) {
    %c0_i32 = arith.constant 0 : i32
    return %arg0, %arg1 : i32, i32
  }
}

</mosaic_0001>

<bundles_post_ra>
// kernel: tpu_custom_call.1
= control target key start
LH: loop header
LB: loop body
LE: loop exit
PB: predicated region body
PF: predicated region fallthrough
CT: control target
= control target key end

     0   :  { %7 = vsyncpa [#allocation4], 0  ;;  %s632_s0 = inlined_call_operand.hbm [shape: bf16[128,128], index: 0, kind: input, shape index: {}]   ;;  %s633_s1 = inlined_call_operand.hbm [shape: bf16[128,128], index: 1, kind: input, shape index: {}]   ;;  %s634_s2 = inlined_call_operand.hbm [shape: bf16[128,128], index: 2, kind: output, shape index: {}]  }
   0x1   :  { %8 = vsyncpa [#allocation7], 0 }
   0x2   :  { %9 = vsyncpa [#allocation5], 0  ;;  %s14_s11 = sshll.u32 %s632_s0, 4  ;;  %s594_s12 = smov [#allocation3]   ;;  %s15_s11 = int_to_ptr.hbm [resolvable:$true] %s14_s11 }
   0x3   :  { %s16_s13 = sshll.u32 %s594_s12, 4  ;;  %s27_s16 = sshll.u32 %s633_s1, 4  ;;  %s17_s13 = int_to_ptr.vmem [resolvable:$true] %s16_s13  ;;  %s28_s16 = int_to_ptr.hbm [resolvable:$true] %s27_s16 }
   0x4   :  { %s595_s17 = smov 64   ;;  %s596_s18 = smov 4  }
   0x5   :  { %22 = dma.hbm_to_vmem [thread:$0]  %s15_s11, 1024, %s17_s13, [#allocation4], %s595_s17, %s595_s17, %s596_s18  }
   0x6   :  { %s597_s19 = smov [#allocation6]  }
   0x7   :  { %s29_s20 = sshll.u32 %s597_s19, 4  ;;  %s30_s20 = int_to_ptr.vmem [resolvable:$true] %s29_s20 }
   0x8   :  { %35 = dma.hbm_to_vmem [thread:$0]  %s28_s16, 1024, %s30_s20, [#allocation7], %s595_s17, %s595_s17, %s596_s18  }
   0x9   :  { %588 = dma.done.wait [#allocation4], 1024  }
   0xa   :  { %589 = vsyncadd [#allocation4], 4294966272 }
   0xb   :  { %590 = dma.done.wait [#allocation7], 1024  }
   0xc   :  { %591 = vsyncadd [#allocation7], 4294966272  ;;  %v439_v0 = vld [vmem:[#allocation6 + $0x38] sm:$0xff]  ;;  %v438_v1 = vld [vmem:[#allocation6 + $0x30] sm:$0xff]  ;;  %s598_s0 = smov [#allocation8]   ;;  %s346_s23 = sshll.u32 %s634_s2, 4  ;;  %s347_s23 = int_to_ptr.hbm [resolvable:$true] %s346_s23 }
   0xd   :  { %208 = vmatpush.bf16.msra.mxu0 %v439_v0  ;;  %487 = vmatpush.bf16.msra.mxu1 %v439_v0  ;;  %v437_v2 = vld [vmem:[#allocation6 + $0x28] sm:$0xff]  ;;  %v436_v3 = vld [vmem:[#allocation6 + $0x20] sm:$0xff]  ;;  %v435_v4 = vld [vmem:[#allocation6 + $0x18] sm:$0xff]  ;;  %s344_s1 = sshll.u32 %s598_s0, 4  ;;  %s345_s1 = int_to_ptr.vmem [resolvable:$true] %s344_s1 }
   0xe   :  { %488 = vmatpush.bf16.msra.mxu2 %v439_v0  ;;  %489 = vmatpush.bf16.msra.mxu3 %v439_v0  ;;  %v434_v5 = vld [vmem:[#allocation6 + $0x10] sm:$0xff]  ;;  %v433_v6 = vld [vmem:[#allocation6 + $0x8] sm:$0xff]  ;;  %v432_v7 = vld [vmem:[#allocation6] sm:$0xff] }
   0xf   :  { %v424_v8 = vld [vmem:[#allocation3] sm:$0xff]  ;;  %v426_v9 = vld [vmem:[#allocation3 + $0x10] sm:$0xff]  ;;  %v425_v12 = vld [vmem:[#allocation3 + $0x8] sm:$0xff] }
  0x10   :  { %v428_v10 = vld [vmem:[#allocation3 + $0x20] sm:$0xff]  ;;  %v430_v11 = vld [vmem:[#allocation3 + $0x30] sm:$0xff]  ;;  %v427_v13 = vld [vmem:[#allocation3 + $0x18] sm:$0xff] }
  0x11   :  { %209 = vmatpush.bf16.msra.mxu0 %v438_v1  ;;  %490 = vmatpush.bf16.msra.mxu1 %v438_v1  ;;  %v429_v14 = vld [vmem:[#allocation3 + $0x28] sm:$0xff]  ;;  %v431_v15 = vld [vmem:[#allocation3 + $0x38] sm:$0xff] }
  0x12   :  { %491 = vmatpush.bf16.msra.mxu2 %v438_v1  ;;  %492 = vmatpush.bf16.msra.mxu3 %v438_v1 }
  0x15   :  { %210 = vmatpush.bf16.msra.mxu0 %v437_v2  ;;  %493 = vmatpush.bf16.msra.mxu1 %v437_v2 }
  0x16   :  { %494 = vmatpush.bf16.msra.mxu2 %v437_v2  ;;  %495 = vmatpush.bf16.msra.mxu3 %v437_v2 }
  0x19   :  { %211 = vmatpush.bf16.msra.mxu0 %v436_v3  ;;  %496 = vmatpush.bf16.msra.mxu1 %v436_v3 }
  0x1a   :  { %497 = vmatpush.bf16.msra.mxu2 %v436_v3  ;;  %498 = vmatpush.bf16.msra.mxu3 %v436_v3 }
  0x1d   :  { %212 = vmatpush.bf16.msra.mxu0 %v435_v4  ;;  %499 = vmatpush.bf16.msra.mxu1 %v435_v4 }
  0x1e   :  { %500 = vmatpush.bf16.msra.mxu2 %v435_v4  ;;  %501 = vmatpush.bf16.msra.mxu3 %v435_v4 }
  0x21   :  { %213 = vmatpush.bf16.msra.mxu0 %v434_v5  ;;  %502 = vmatpush.bf16.msra.mxu1 %v434_v5 }
  0x22   :  { %503 = vmatpush.bf16.msra.mxu2 %v434_v5  ;;  %504 = vmatpush.bf16.msra.mxu3 %v434_v5 }
  0x25   :  { %214 = vmatpush.bf16.msra.mxu0 %v433_v6  ;;  %505 = vmatpush.bf16.msra.mxu1 %v433_v6 }
  0x26   :  { %506 = vmatpush.bf16.msra.mxu2 %v433_v6  ;;  %507 = vmatpush.bf16.msra.mxu3 %v433_v6 }
  0x29   :  { %215 = vmatpush.bf16.msra.mxu0 %v432_v7  ;;  %508 = vmatpush.bf16.msra.mxu1 %v432_v7 }
  0x2a   :  { %509 = vmatpush.bf16.msra.mxu2 %v432_v7  ;;  %510 = vmatpush.bf16.msra.mxu3 %v432_v7 }
  0x2c   :  { %216 = vmatmul.bf16.vlgmr.msra.gmra.mxu0 %v424_v8  ;;  %226 = vmatmul.bf16.vlgmr.msra.gmra.mxu1 %v426_v9 }
  0x2d   :  { %236 = vmatmul.bf16.vlgmr.msra.gmra.mxu2 %v428_v10  ;;  %246 = vmatmul.bf16.vlgmr.msra.gmra.mxu3 %v430_v11 }
  0x3c   :  { %221 = vmatmul.bf16.gmra.mxu0 %v425_v12  ;;  %231 = vmatmul.bf16.gmra.mxu1 %v427_v13 }
  0x3d   :  { %241 = vmatmul.bf16.gmra.mxu2 %v429_v14  ;;  %251 = vmatmul.bf16.gmra.mxu3 %v431_v15 }
  0xa9   :  { %v217_v16 = vpop.f32.mrf.mxu0  ;;  %v227_v17 = vpop.f32.mrf.mxu1 }
  0xb0   :  { %v237_v18 = vpop.f32.mrf.mxu2  ;;  %v247_v19 = vpop.f32.mrf.mxu3 }
  0xb1   :  { %v219_v20 = vpop.f32.mrf.mxu0  ;;  %v229_v21 = vpop.f32.mrf.mxu1 }
  0xb2   :  { %v443_v22 = vpack.c.bf16 %v219_v20, %v217_v16  ;;  %v453_v23 = vpack.c.bf16 %v229_v21, %v227_v17 }
  0xb4   :  { %444 = vst [vmem:[#allocation8] sm:$0xff] %v443_v22  }
  0xb5   :  { %481 = vst [vmem:[#allocation8 + $0x10] sm:$0xff] %v453_v23  }
  0xb8   :  { %v239_v24 = vpop.f32.mrf.mxu2  ;;  %v249_v25 = vpop.f32.mrf.mxu3 }
  0xb9   :  { %v463_v26 = vpack.c.bf16 %v239_v24, %v237_v18  ;;  %v473_v27 = vpack.c.bf16 %v249_v25, %v247_v19  ;;  %v222_v28 = vpop.f32.mrf.mxu0  ;;  %v232_v29 = vpop.f32.mrf.mxu1 }
  0xbb   :  { %483 = vst [vmem:[#allocation8 + $0x20] sm:$0xff] %v463_v26  }
  0xbc   :  { %485 = vst [vmem:[#allocation8 + $0x30] sm:$0xff] %v473_v27  }
  0xc0   :  { %v242_v30 = vpop.f32.mrf.mxu2  ;;  %v252_v31 = vpop.f32.mrf.mxu3 }
  0xc1   :  { %v224_v32 = vpop.f32.mrf.mxu0  ;;  %v234_v33 = vpop.f32.mrf.mxu1 }
  0xc2   :  { %v448_v34 = vpack.c.bf16 %v224_v32, %v222_v28  ;;  %v458_v35 = vpack.c.bf16 %v234_v33, %v232_v29 }
  0xc4   :  { %480 = vst [vmem:[#allocation8 + $0x8] sm:$0xff] %v448_v34  }
  0xc5   :  { %482 = vst [vmem:[#allocation8 + $0x18] sm:$0xff] %v458_v35  }
  0xc8   :  { %v244_v36 = vpop.f32.mrf.mxu2  ;;  %v254_v37 = vpop.f32.mrf.mxu3 }
  0xc9   :  { %v468_v38 = vpack.c.bf16 %v244_v36, %v242_v30  ;;  %v478_v39 = vpack.c.bf16 %v254_v37, %v252_v31 }
  0xcb   :  { %484 = vst [vmem:[#allocation8 + $0x28] sm:$0xff] %v468_v38  }
  0xcc   :  { %486 = vst [vmem:[#allocation8 + $0x38] sm:$0xff] %v478_v39  }
  0xcd   :  { %352 = dma.vmem_to_hbm [thread:$0]  %s345_s1, 1024, %s347_s23, [#allocation5], %s595_s17, %s595_s17, %s596_s18  }
  0xce   :  { %592 = dma.done.wait [#allocation5], 1024  }
  0xcf   :  { %593 = vsyncadd [#allocation5], 4294966272 }
  0xd0   :  { %357 = vsyncpa [#allocation4], 1 }
  0xd1   :  { %358 = vsyncpa [#allocation7], 1 }
  0xd2   :  { %359 = vsyncpa [#allocation5], 1 }

</bundles_post_ra>
